<compile_context>
chip_gen: v7x
topology: tpu7x:2x2x1
jax: 0.10.0
libtpu: 0.0.40
codegen_flags: <defaults>
</compile_context>

<pallas_src>
import functools

import numpy as np
import jax
import jax.numpy as jnp
from jax.experimental import pallas as pl
from jax.experimental.pallas import tpu as pltpu


def _lif_kernel(x_ref, tau_ref, vth_ref, out_ref, u_prev_ref, *,
                lif, axis, pad, r_full):
    """LIF recurrence along `axis` of the block (axis is fully resident in-block).

    x_ref/out_ref : (.., L, ..) VMEM blocks, recurrence axis length L.
    tau_ref/vth_ref : (1,) SMEM scalars.
    u_prev_ref : VMEM scratch, `pad` extra leading positions along `axis`,
                 used to realise the shift-by-one of the running potential u.

    Reference semantics (per group of `lif` consecutive positions, o_0 = 0):
        u_j   = tau * o_j + x_j
        out_j = u_j if u_j > vth else vth            (== max(u_j, vth))
        o_j+1 = 0   if u_j > vth else u_j
    Positions past the last full group are a pure passthrough.
    """
    tau = tau_ref[0]
    vth = vth_ref[0]
    x = x_ref[...].astype(jnp.float32)
    shape = x.shape
    length = shape[axis]

    idx = jax.lax.broadcasted_iota(jnp.int32, shape, axis)
    # At a group's first position the carry is 0 by construction; emulate it with an
    # unattainable threshold so the select below always yields 0 there (this also makes
    # the value read from the scratch pad region irrelevant, NaN included).
    vth_eff = jnp.where(idx % lif == 0, -jnp.inf, vth)

    def window(start):
        ix = [slice(None)] * len(shape)
        ix[axis] = pl.ds(start, length)
        return tuple(ix)

    if lif > 1:
        # Zero the pad region once per block: it is the "carry before position 0".
        pad_ix = [slice(None)] * len(shape)
        pad_ix[axis] = pl.ds(0, pad)
        pad_shape = list(shape)
        pad_shape[axis] = pad
        u_prev_ref[tuple(pad_ix)] = jnp.zeros(tuple(pad_shape), jnp.float32)

    # Fixed-point iteration: after k steps every position with (idx % lif) <= k holds
    # its converged u.  Group-start positions always recompute u = x (o forced to 0).
    u = x
    for _ in range(lif - 1):
        u_prev_ref[window(pad)] = u                 # dense store, aligned start
        up = u_prev_ref[window(pad - 1)]            # same window shifted back by one
        o = jnp.where(up <= vth_eff, up, 0.0)       # spike -> reset carry to 0
        u = x + tau * o

    out = jnp.maximum(u, vth)
    if r_full < length:                             # static: trailing passthrough
        out = jnp.where(idx < r_full, out, x)
    out_ref[...] = out.astype(out_ref.dtype)


def lif_spike_forward(x, tau, vth, lif, dim, *, block_bytes=1 << 20):
    """LIFSpike.forward.  x: (N, C, H, W); tau, vth: scalars or (1,) arrays."""
    if lif == -1:
        return x
    assert dim in (2, 3)
    N, C, H, W = x.shape
    L = H if dim == 2 else W
    nblk = L // lif
    if nblk == 0:
        # Every row/col lies in the trailing partial group -> pure passthrough.
        return x
    r_full = nblk * lif

    tau = jnp.asarray(tau, jnp.float32).reshape((1,))
    vth = jnp.asarray(vth, jnp.float32).reshape((1,))
    esz = 4  # f32 working set inside the kernel

    if dim == 2:
        # Recurrence along H (sublanes).  (N,C,H,W) -> (N*C, H, W) is a free reshape.
        y = x.reshape(N * C, H, W)
        M = N * C
        lane_budget = max(128, (block_bytes // (H * esz)) // 128 * 128)
        tw = W if W <= lane_budget else lane_budget          # full W or multiple of 128
        bm = max(1, min(M, block_bytes // (H * tw * esz)))
        grid = (pl.cdiv(M, bm), pl.cdiv(W, tw))
        block = (bm, H, tw)
        index_map = lambda i, j: (i, 0, j)
        axis, pad = 1, 8
        scratch = pltpu.VMEM((bm, H + pad, tw), jnp.float32)
        dims_sem = ("parallel", "parallel")
    else:
        # Recurrence along W (lanes).  (N,C,H,W) -> (N*C*H, W) is a free reshape.
        y = x.reshape(N * C * H, W)
        M = N * C * H
        if M * W * esz <= block_bytes or M <= 8:
            bs = M                                            # full dim -> always legal
        else:
            bs = max(8, (block_bytes // (W * esz)) // 8 * 8)  # multiple of 8 sublanes
            bs = min(bs, (M // 8) * 8)
        grid = (pl.cdiv(M, bs),)
        block = (bs, W)
        index_map = lambda i: (i, 0)
        axis, pad = 1, 128
        scratch = pltpu.VMEM((bs, W + pad), jnp.float32)
        dims_sem = ("parallel",)

    out = pl.pallas_call(
        functools.partial(_lif_kernel, lif=lif, axis=axis, pad=pad, r_full=r_full),
        out_shape=jax.ShapeDtypeStruct(y.shape, y.dtype),
        grid=grid,
        in_specs=[
            pl.BlockSpec(block, index_map),
            pl.BlockSpec(memory_space=pltpu.MemorySpace.SMEM),   # tau
            pl.BlockSpec(memory_space=pltpu.MemorySpace.SMEM),   # vth
        ],
        out_specs=pl.BlockSpec(block, index_map),
        scratch_shapes=[scratch],
        compiler_params=pltpu.CompilerParams(
            dimension_semantics=dims_sem,
            vmem_limit_bytes=32 * 1024 * 1024,
        ),
    )(y, tau, vth)

    return out.reshape(N, C, H, W)


def _lif_ref_np(x, tau, vth, s, dim):
    """Pure-numpy reference of the CUDA forward kernels (lif_forward_kernel_h/w)."""
    x = np.asarray(x, dtype=np.float32)
    if dim == 3:
        x = np.swapaxes(x, 2, 3)
    N, C, H, W = x.shape
    lifhh = H // s
    out = x.copy()  # passthrough rows already correct
    for n in range(N):
        for c in range(C):
            for b in range(lifhh):
                o = np.zeros(W, dtype=np.float32)
                for j in range(s):
                    r = b * s + j
                    u = tau * o + x[n, c, r]
                    flag = u > vth
                    o = np.where(flag, 0.0, u)
                    out[n, c, r] = np.where(flag, u, vth)
    if dim == 3:
        out = np.swapaxes(out, 2, 3)
    return out


if __name__ == "__main__":
    # LIFSpike.__init__ defaults: init_tau=0.25, init_vth=-1.0
    lif = 4
    tau = jnp.array([0.25], dtype=jnp.float32)
    vth = jnp.array([-1.0], dtype=jnp.float32)

    fwd = jax.jit(lif_spike_forward, static_argnames=("lif", "dim", "block_bytes"))

    k1, k2, k3 = jax.random.split(jax.random.PRNGKey(0), 3)
    x1 = jax.random.normal(k1, (2, 4, 18, 32), dtype=jnp.float32)  # H % lif != 0 (tail rows)
    x2 = jax.random.normal(k2, (2, 4, 16, 16), dtype=jnp.float32)  # exact multiples
    x3 = jax.random.normal(k3, (2, 4, 16, 18), dtype=jnp.float32)  # W % lif != 0 (tail cols)

    cases = [
        (x1, dict(dim=2)),                        # recurrence along H + tail passthrough
        (x2, dict(dim=2, block_bytes=4096)),      # forced multi-step grid (dim=2)
        (x2, dict(dim=3)),                        # recurrence along W
        (x2, dict(dim=3, block_bytes=4096)),      # forced multi-step grid (dim=3)
        (x3, dict(dim=3)),                        # recurrence along W + tail passthrough
    ]
    for xx, cfg in cases:
        out = jax.block_until_ready(fwd(xx, tau, vth, lif=lif, **cfg))
        ref = _lif_ref_np(np.asarray(xx), 0.25, -1.0, lif, cfg["dim"])
        assert np.allclose(np.asarray(out), ref, atol=1e-5, rtol=1e-5), cfg

    print("KERNEL_OK")
</pallas_src>

<mosaic_0001>
module attributes {stable_mosaic.version = 11 : i64} {
  func.func @_lif_kernel(%arg0: i32, %arg1: i32, %arg2: memref<8x18x32xf32, #tpu.memory_space<vmem>>, %arg3: memref<1xf32, #tpu.memory_space<smem>>, %arg4: memref<1xf32, #tpu.memory_space<smem>>, %arg5: memref<8x18x32xf32, #tpu.memory_space<vmem>>, %arg6: memref<8x26x32xf32, #tpu.memory_space<vmem>>) attributes {dimension_semantics = [#tpu.dimension_semantics<parallel>, #tpu.dimension_semantics<parallel>], iteration_bounds = array<i64: 1, 1>, scalar_prefetch = 0 : i64, scratch_operands = 1 : i64, tpu.core_type = #tpu.core_type<tc>, window_params = [{transform_indices = @transform_0, window_bounds = array<i64: 8, 18, 32>}, {transform_indices = @transform_1, window_bounds = array<i64: 1>}, {transform_indices = @transform_2, window_bounds = array<i64: 1>}, {transform_indices = @transform_3, window_bounds = array<i64: 8, 18, 32>}]} {
    %c0 = arith.constant 0 : index
    %0 = memref.load %arg3[%c0] : memref<1xf32, #tpu.memory_space<smem>>
    %c0_0 = arith.constant 0 : index
    %1 = memref.load %arg4[%c0_0] : memref<1xf32, #tpu.memory_space<smem>>
    %c0_1 = arith.constant 0 : index
    %c0_2 = arith.constant 0 : index
    %c0_3 = arith.constant 0 : index
    %2 = vector.load %arg2[%c0_1, %c0_2, %c0_3] : memref<8x18x32xf32, #tpu.memory_space<vmem>>, vector<8x18x32xf32>
    %3 = tpu.iota {dimensions = array<i32: 1>} : vector<8x18x32xi32>
    %c4_i32 = arith.constant 4 : i32
    %c0_i32 = arith.constant 0 : i32
    %4 = arith.cmpi eq, %c4_i32, %c0_i32 : i32
    %c1_i32 = arith.constant 1 : i32
    %5 = arith.select %4, %c1_i32, %c4_i32 : i32
    %6 = vector.broadcast %5 : i32 to vector<8x18x32xi32>
    %7 = arith.remsi %3, %6 : vector<8x18x32xi32>
    %c0_i32_4 = arith.constant 0 : i32
    %8 = vector.broadcast %c0_i32_4 : i32 to vector<8x18x32xi32>
    %9 = arith.cmpi ne, %7, %8 : vector<8x18x32xi32>
    %c0_i32_5 = arith.constant 0 : i32
    %10 = vector.broadcast %c0_i32_5 : i32 to vector<8x18x32xi32>
    %11 = arith.cmpi slt, %7, %10 : vector<8x18x32xi32>
    %c0_i32_6 = arith.constant 0 : i32
    %12 = arith.cmpi slt, %5, %c0_i32_6 : i32
    %13 = vector.broadcast %12 : i1 to vector<8x18x32xi1>
    %14 = vector.broadcast %13 : vector<8x18x32xi1> to vector<8x18x32xi1>
    %15 = arith.xori %11, %14 : vector<8x18x32xi1>
    %16 = arith.andi %15, %9 : vector<8x18x32xi1>
    %17 = vector.broadcast %5 : i32 to vector<8x18x32xi32>
    %18 = arith.addi %7, %17 : vector<8x18x32xi32>
    %19 = arith.select %16, %18, %7 : vector<8x18x32xi1>, vector<8x18x32xi32>
    %c0_i32_7 = arith.constant 0 : i32
    %20 = vector.broadcast %c0_i32_7 : i32 to vector<8x18x32xi32>
    %21 = arith.cmpi eq, %19, %20 : vector<8x18x32xi32>
    %cst = arith.constant 0xFF800000 : f32
    %22 = vector.broadcast %cst : f32 to vector<8x18x32xf32>
    %23 = vector.broadcast %1 : f32 to vector<8x18x32xf32>
    %24 = arith.select %21, %22, %23 : vector<8x18x32xi1>, vector<8x18x32xf32>
    %cst_8 = arith.constant 0.000000e+00 : f32
    %25 = vector.broadcast %cst_8 : f32 to vector<8x8x32xf32>
    %c0_9 = arith.constant 0 : index
    %c0_10 = arith.constant 0 : index
    %c0_11 = arith.constant 0 : index
    %26 = vector.load %arg6[%c0_9, %c0_10, %c0_11] : memref<8x26x32xf32, #tpu.memory_space<vmem>>, vector<8x8x32xf32>
    tpu.vector_store %arg6[%c0_9, %c0_10, %c0_11], %25 {strides = array<i32>} : memref<8x26x32xf32, #tpu.memory_space<vmem>>, vector<8x8x32xf32>,
    %c0_12 = arith.constant 0 : index
    %c8 = arith.constant 8 : index
    %c0_13 = arith.constant 0 : index
    %27 = vector.load %arg6[%c0_12, %c8, %c0_13] : memref<8x26x32xf32, #tpu.memory_space<vmem>>, vector<8x18x32xf32>
    tpu.vector_store %arg6[%c0_12, %c8, %c0_13], %2 {strides = array<i32>} : memref<8x26x32xf32, #tpu.memory_space<vmem>>, vector<8x18x32xf32>,
    %c0_14 = arith.constant 0 : index
    %c7 = arith.constant 7 : index
    %c0_15 = arith.constant 0 : index
    %28 = vector.load %arg6[%c0_14, %c7, %c0_15] : memref<8x26x32xf32, #tpu.memory_space<vmem>>, vector<8x18x32xf32>
    %29 = arith.cmpf ole, %28, %24 : vector<8x18x32xf32>
    %cst_16 = arith.constant 0.000000e+00 : f32
    %30 = vector.broadcast %cst_16 : f32 to vector<8x18x32xf32>
    %31 = arith.select %29, %28, %30 : vector<8x18x32xi1>, vector<8x18x32xf32>
    %32 = vector.broadcast %0 : f32 to vector<8x18x32xf32>
    %33 = arith.mulf %32, %31 : vector<8x18x32xf32>
    %34 = arith.addf %2, %33 : vector<8x18x32xf32>
    %c0_17 = arith.constant 0 : index
    %c8_18 = arith.constant 8 : index
    %c0_19 = arith.constant 0 : index
    %35 = vector.load %arg6[%c0_17, %c8_18, %c0_19] : memref<8x26x32xf32, #tpu.memory_space<vmem>>, vector<8x18x32xf32>
    tpu.vector_store %arg6[%c0_17, %c8_18, %c0_19], %34 {strides = array<i32>} : memref<8x26x32xf32, #tpu.memory_space<vmem>>, vector<8x18x32xf32>,
    %c0_20 = arith.constant 0 : index
    %c7_21 = arith.constant 7 : index
    %c0_22 = arith.constant 0 : index
    %36 = vector.load %arg6[%c0_20, %c7_21, %c0_22] : memref<8x26x32xf32, #tpu.memory_space<vmem>>, vector<8x18x32xf32>
    %37 = arith.cmpf ole, %36, %24 : vector<8x18x32xf32>
    %cst_23 = arith.constant 0.000000e+00 : f32
    %38 = vector.broadcast %cst_23 : f32 to vector<8x18x32xf32>
    %39 = arith.select %37, %36, %38 : vector<8x18x32xi1>, vector<8x18x32xf32>
    %40 = vector.broadcast %0 : f32 to vector<8x18x32xf32>
    %41 = arith.mulf %40, %39 : vector<8x18x32xf32>
    %42 = arith.addf %2, %41 : vector<8x18x32xf32>
    %c0_24 = arith.constant 0 : index
    %c8_25 = arith.constant 8 : index
    %c0_26 = arith.constant 0 : index
    %43 = vector.load %arg6[%c0_24, %c8_25, %c0_26] : memref<8x26x32xf32, #tpu.memory_space<vmem>>, vector<8x18x32xf32>
    tpu.vector_store %arg6[%c0_24, %c8_25, %c0_26], %42 {strides = array<i32>} : memref<8x26x32xf32, #tpu.memory_space<vmem>>, vector<8x18x32xf32>,
    %c0_27 = arith.constant 0 : index
    %c7_28 = arith.constant 7 : index
    %c0_29 = arith.constant 0 : index
    %44 = vector.load %arg6[%c0_27, %c7_28, %c0_29] : memref<8x26x32xf32, #tpu.memory_space<vmem>>, vector<8x18x32xf32>
    %45 = arith.cmpf ole, %44, %24 : vector<8x18x32xf32>
    %cst_30 = arith.constant 0.000000e+00 : f32
    %46 = vector.broadcast %cst_30 : f32 to vector<8x18x32xf32>
    %47 = arith.select %45, %44, %46 : vector<8x18x32xi1>, vector<8x18x32xf32>
    %48 = vector.broadcast %0 : f32 to vector<8x18x32xf32>
    %49 = arith.mulf %48, %47 : vector<8x18x32xf32>
    %50 = arith.addf %2, %49 : vector<8x18x32xf32>
    %51 = vector.broadcast %1 : f32 to vector<8x18x32xf32>
    %52 = arith.maximumf %50, %51 : vector<8x18x32xf32>
    %c16_i32 = arith.constant 16 : i32
    %53 = vector.broadcast %c16_i32 : i32 to vector<8x18x32xi32>
    %54 = arith.cmpi slt, %3, %53 : vector<8x18x32xi32>
    %55 = arith.select %54, %52, %2 : vector<8x18x32xi1>, vector<8x18x32xf32>
    %c0_31 = arith.constant 0 : index
    %c0_32 = arith.constant 0 : index
    %c0_33 = arith.constant 0 : index
    %56 = vector.load %arg5[%c0_31, %c0_32, %c0_33] : memref<8x18x32xf32, #tpu.memory_space<vmem>>, vector<8x18x32xf32>
    tpu.vector_store %arg5[%c0_31, %c0_32, %c0_33], %55 {strides = array<i32>} : memref<8x18x32xf32, #tpu.memory_space<vmem>>, vector<8x18x32xf32>,
    return
  }
  func.func @transform_0(%arg0: i32, %arg1: i32) -> (i32, i32, i32) {
    %c0_i32 = arith.constant 0 : i32
    %c0_i32_0 = arith.constant 0 : i32
    return %arg0, %c0_i32, %arg1 : i32, i32, i32
  }
  func.func @transform_1(%arg0: i32, %arg1: i32) -> i32 {
    %c0_i32 = arith.constant 0 : i32
    %c0_i32_0 = arith.constant 0 : i32
    return %c0_i32 : i32
  }
  func.func @transform_2(%arg0: i32, %arg1: i32) -> i32 {
    %c0_i32 = arith.constant 0 : i32
    %c0_i32_0 = arith.constant 0 : i32
    return %c0_i32 : i32
  }
  func.func @transform_3(%arg0: i32, %arg1: i32) -> (i32, i32, i32) {
    %c0_i32 = arith.constant 0 : i32
    %c0_i32_0 = arith.constant 0 : i32
    return %arg0, %c0_i32, %arg1 : i32, i32, i32
  }
}

</mosaic_0001>

<bundles_post_ra>
// kernel: lif_spike_forward.1
= control target key start
LH: loop header
LB: loop body
LE: loop exit
PB: predicated region body
PF: predicated region fallthrough
CT: control target
= control target key end

     0   :  { %vm89_vm0 = vcmask 261120   ;;  %v42_v0 = vlaneseq  ;;  %vm100_vm1 = vcmask 254976   ;;  %v612_v1 = vmov 0.0   ;;  %s1188_s0 = inlined_call_operand.vmem [shape: f32[8,18,32], index: 0, kind: input, shape index: {}]   ;;  %s1189_s3 = inlined_call_operand.vmem [shape: f32[8,18,32], index: 3, kind: output, shape index: {}]   ;;  %s1190_s2 = inlined_call_operand.<no memory space> [shape: f32[1], index: 2, kind: input, shape index: {}]   ;;  %s1191_s1 = inlined_call_operand.<no memory space> [shape: f32[1], index: 1, kind: input, shape index: {}]  }
   0x1   :  { %90 = vst.msk [vmem:[#allocation2] sm:$0xff] %vm89_vm0, %v612_v1  ;;  %91 = vst.msk [vmem:[#allocation2 + $0x20] sm:$0xff] %vm89_vm0, %v612_v1  ;;  %v644_v2 = vld [vmem:[%s1188_s0] sm:$0xff]  ;;  %v649_v3 = vld [vmem:[%s1188_s0 + $0x8] sm:$0xff]  ;;  %v699_v12 = vstv %s1190_s2  ;;  %v840_v35 = vstv %s1191_s1 }
   0x2   :  { %92 = vst.msk [vmem:[#allocation2 + $0x40] sm:$0xff] %vm89_vm0, %v612_v1  ;;  %93 = vst.msk [vmem:[#allocation2 + $0x60] sm:$0xff] %vm89_vm0, %v612_v1  ;;  %v43_v4 = vshrl.u32 %v42_v0, 7  ;;  %v658_v5 = vld [vmem:[%s1188_s0 + $0x10] sm:$0x3]  ;;  %v663_v6 = vld [vmem:[%s1188_s0 + $0x18] sm:$0xff] }
   0x3   :  { %94 = vst.msk [vmem:[#allocation2 + $0x80] sm:$0xff] %vm89_vm0, %v612_v1  ;;  %95 = vst.msk [vmem:[#allocation2 + $0xa0] sm:$0xff] %vm89_vm0, %v612_v1  ;;  %v668_v7 = vld [vmem:[%s1188_s0 + $0x20] sm:$0xff]  ;;  %v679_v8 = vld [vmem:[%s1188_s0 + $0x28] sm:$0x3] }
   0x4   :  { %96 = vst.msk [vmem:[#allocation2 + $0xc0] sm:$0xff] %vm89_vm0, %v612_v1  ;;  %97 = vst.msk [vmem:[#allocation2 + $0xe0] sm:$0xff] %vm89_vm0, %v612_v1  ;;  %v684_v9 = vld [vmem:[%s1188_s0 + $0x30] sm:$0xff]  ;;  %v689_v10 = vld [vmem:[%s1188_s0 + $0x38] sm:$0xff]  ;;  %v44_v11 = vadd.s32 8, %v43_v4  ;;  %v50_v16 = vand.u32 3, %v43_v4 }
   0x5   :  { %98 = vst.msk [vmem:[#allocation2 + $0x8] sm:$0xff] %vm89_vm0, %v644_v2  ;;  %99 = vst.msk [vmem:[#allocation2 + $0x10] sm:$0xff] %vm89_vm0, %v649_v3  ;;  %v710_v13 = vld [vmem:[%s1188_s0 + $0x40] sm:$0x3]  ;;  %v715_v14 = vld [vmem:[%s1188_s0 + $0x48] sm:$0xff]  ;;  %v45_v20 = vadd.s32 16, %v43_v4 }
   0x6   :  { %101 = vst.msk [vmem:[#allocation2 + $0x18] sm:$0x3] %vm100_vm1, %v658_v5  ;;  %585 = vst.msk [vmem:[%s1189_s3 + $0x10] sm:$0x3] %vm100_vm1, %v658_v5  ;;  %v720_v15 = vld [vmem:[%s1188_s0 + $0x50] sm:$0xff]  ;;  %v741_v18 = vld [vmem:[%s1188_s0 + $0x60] sm:$0xff] }
   0x7   :  { %102 = vst.msk [vmem:[#allocation2 + $0x28] sm:$0xff] %vm89_vm0, %v663_v6  ;;  %103 = vst.msk [vmem:[#allocation2 + $0x30] sm:$0xff] %vm89_vm0, %v668_v7  ;;  %v736_v17 = vld [vmem:[%s1188_s0 + $0x58] sm:$0x3]  ;;  %v746_v19 = vld [vmem:[%s1188_s0 + $0x68] sm:$0xff]  ;;  %v57_v21 = vand.u32 3, %v44_v11 }
   0x8   :  { %104 = vst.msk [vmem:[#allocation2 + $0x38] sm:$0x3] %vm100_vm1, %v679_v8  ;;  %588 = vst.msk [vmem:[%s1189_s3 + $0x28] sm:$0x3] %vm100_vm1, %v679_v8  ;;  %v762_v22 = vld [vmem:[%s1188_s0 + $0x70] sm:$0x3] }
   0x9   :  { %105 = vst.msk [vmem:[#allocation2 + $0x48] sm:$0xff] %vm89_vm0, %v684_v9  ;;  %106 = vst.msk [vmem:[#allocation2 + $0x50] sm:$0xff] %vm89_vm0, %v689_v10  ;;  %v767_v23 = vld [vmem:[%s1188_s0 + $0x78] sm:$0xff]  ;;  %v772_v24 = vld [vmem:[%s1188_s0 + $0x80] sm:$0xff]  ;;  %vm82_vm2 = vcmp.eq.s32.totalorder %v50_v16, 0  ;;  %v64_v29 = vand.u32 3, %v45_v20 }
   0xa   :  { %107 = vst.msk [vmem:[#allocation2 + $0x58] sm:$0x3] %vm100_vm1, %v710_v13  ;;  %591 = vst.msk [vmem:[%s1189_s3 + $0x40] sm:$0x3] %vm100_vm1, %v710_v13  ;;  %v788_v25 = vld [vmem:[%s1188_s0 + $0x88] sm:$0x3] }
   0xb   :  { %108 = vst.msk [vmem:[#allocation2 + $0x68] sm:$0xff] %vm89_vm0, %v715_v14  ;;  %109 = vst.msk [vmem:[#allocation2 + $0x70] sm:$0xff] %vm89_vm0, %v720_v15  ;;  %v793_v26 = vld [vmem:[%s1188_s0 + $0x90] sm:$0xff]  ;;  %v798_v27 = vld [vmem:[%s1188_s0 + $0x98] sm:$0xff]  ;;  %v801_v28 = vsel %vm82_vm2, -inf, %v699_v12  ;;  %vm83_vm3 = vcmp.eq.s32.totalorder %v57_v21, 0 }
   0xc   :  { %110 = vst.msk [vmem:[#allocation2 + $0x78] sm:$0x3] %vm100_vm1, %v736_v17  ;;  %594 = vst.msk [vmem:[%s1189_s3 + $0x58] sm:$0x3] %vm100_vm1, %v736_v17  ;;  %v817_v30 = vld [vmem:[%s1188_s0 + $0xa0] sm:$0x3] }
   0xd   :  { %111 = vst.msk [vmem:[#allocation2 + $0x88] sm:$0xff] %vm89_vm0, %v741_v18  ;;  %112 = vst.msk [vmem:[#allocation2 + $0x90] sm:$0xff] %vm89_vm0, %v746_v19  ;;  %v822_v31 = vld [vmem:[%s1188_s0 + $0xa8] sm:$0xff]  ;;  %v827_v32 = vld [vmem:[%s1188_s0 + $0xb0] sm:$0xff]  ;;  %v835_v33 = vsel %vm83_vm3, -inf, %v699_v12  ;;  %vm84_vm4 = vcmp.eq.s32.totalorder %v64_v29, 0 }
   0xe   :  { %113 = vst.msk [vmem:[#allocation2 + $0x98] sm:$0x3] %vm100_vm1, %v762_v22  ;;  %597 = vst.msk [vmem:[%s1189_s3 + $0x70] sm:$0x3] %vm100_vm1, %v762_v22  ;;  %v124_v34 = vld [vmem:[#allocation2 + $0xf] sm:$0xff]  ;;  %v123_v37 = vld [vmem:[#allocation2 + $0x7] sm:$0xff] }
   0xf   :  { %114 = vst.msk [vmem:[#allocation2 + $0xa8] sm:$0xff] %vm89_vm0, %v767_v23  ;;  %115 = vst.msk [vmem:[#allocation2 + $0xb0] sm:$0xff] %vm89_vm0, %v772_v24  ;;  %v851_v36 = vld [vmem:[%s1188_s0 + $0xb8] sm:$0x3]  ;;  %vm148_vm5 = vcmp.le.f32.partialorder %v124_v34, %v835_v33  ;;  %v127_v38 = vld [vmem:[#allocation2 + $0x2f] sm:$0xff]  ;;  %vm147_vm6 = vcmp.le.f32.partialorder %v123_v37, %v801_v28  ;;  %v863_v40 = vsel %vm84_vm4, -inf, %v699_v12 }
  0x10   :  { %116 = vst.msk [vmem:[#allocation2 + $0xb8] sm:$0x3] %vm100_vm1, %v788_v25  ;;  %600 = vst.msk [vmem:[%s1189_s3 + $0x88] sm:$0x3] %vm100_vm1, %v788_v25  ;;  %v125_v39 = vld [vmem:[#allocation2 + $0x17] sm:$0x3]  ;;  %vm151_vm7 = vcmp.le.f32.partialorder %v127_v38, %v835_v33 }
  0x11   :  { %117 = vst.msk [vmem:[#allocation2 + $0xc8] sm:$0xff] %vm89_vm0, %v793_v26  ;;  %118 = vst.msk [vmem:[#allocation2 + $0xd0] sm:$0xff] %vm89_vm0, %v798_v27  ;;  %v172_v41 = vsel %vm148_vm5, %v124_v34, 0.0  ;;  %v130_v42 = vld [vmem:[#allocation2 + $0x4f] sm:$0xff]  ;;  %v171_v43 = vsel %vm147_vm6, %v123_v37, 0.0  ;;  %vm149_vm8 = vcmp.le.f32.partialorder %v125_v39, %v863_v40  ;;  %v175_v45 = vsel %vm151_vm7, %v127_v38, 0.0 }
  0x12   :  { %119 = vst.msk [vmem:[#allocation2 + $0xd8] sm:$0x3] %vm100_vm1, %v817_v30  ;;  %603 = vst.msk [vmem:[%s1189_s3 + $0xa0] sm:$0x3] %vm100_vm1, %v817_v30  ;;  %v197_v44 = vmul.f32 %v840_v35, %v172_v41  ;;  %vm154_vm9 = vcmp.le.f32.partialorder %v130_v42, %v835_v33  ;;  %v133_v46 = vld [vmem:[#allocation2 + $0x6f] sm:$0xff]  ;;  %v196_v47 = vmul.f32 %v840_v35, %v171_v43  ;;  %v173_v51 = vsel %vm149_vm8, %v125_v39, 0.0 }
  0x13   :  { %120 = vst.msk [vmem:[#allocation2 + $0xe8] sm:$0xff] %vm89_vm0, %v822_v31  ;;  %121 = vst.msk [vmem:[#allocation2 + $0xf0] sm:$0xff] %vm89_vm0, %v827_v32  ;;  %v200_v48 = vmul.f32 %v840_v35, %v175_v45  ;;  %v178_v49 = vsel %vm154_vm9, %v130_v42, 0.0  ;;  %vm157_vm10 = vcmp.le.f32.partialorder %v133_v46, %v835_v33  ;;  %v126_v0 = vld [vmem:[#allocation2 + $0x27] sm:$0xff]  ;;  %v128_v1 = vld [vmem:[#allocation2 + $0x37] sm:$0x3]  ;;  %v198_v43 = vmul.f32 %v840_v35, %v173_v51 }
  0x14   :  { %122 = vst.msk [vmem:[#allocation2 + $0xf8] sm:$0x3] %vm100_vm1, %v851_v36  ;;  %606 = vst.msk [vmem:[%s1189_s3 + $0xb8] sm:$0x3] %vm100_vm1, %v851_v36  ;;  %v136_v50 = vld [vmem:[#allocation2 + $0x8f] sm:$0xff]  ;;  %v221_v52 = vadd.f32 %v197_v44, %v649_v3  ;;  %v203_v53 = vmul.f32 %v840_v35, %v178_v49  ;;  %v181_v54 = vsel %vm157_vm10, %v133_v46, 0.0  ;;  %v220_v38 = vadd.f32 %v196_v47, %v644_v2 }
  0x15   :  { %vm160_vm11 = vcmp.le.f32.partialorder %v136_v50, %v835_v33  ;;  %v224_v56 = vadd.f32 %v200_v48, %v668_v7  ;;  %v206_v57 = vmul.f32 %v840_v35, %v181_v54  ;;  %v129_v20 = vld [vmem:[#allocation2 + $0x47] sm:$0xff]  ;;  %v131_v21 = vld [vmem:[#allocation2 + $0x57] sm:$0x3]  ;;  %vm150_vm15 = vcmp.le.f32.partialorder %v126_v0, %v801_v28 }
  0x16   :  { %v139_v55 = vld [vmem:[#allocation2 + $0xaf] sm:$0xff]  ;;  %v184_v58 = vsel %vm160_vm11, %v136_v50, 0.0  ;;  %v227_v60 = vadd.f32 %v203_v53, %v689_v10  ;;  %245 = vst.msk [vmem:[#allocation2 + $0x10] sm:$0xff] %vm89_vm0, %v221_v52  ;;  %v134_v39 = vld [vmem:[#allocation2 + $0x77] sm:$0x3]  ;;  %v132_v44 = vld [vmem:[#allocation2 + $0x67] sm:$0xff]  ;;  %vm152_vm2 = vcmp.le.f32.partialorder %v128_v1, %v863_v40  ;;  %vm153_vm3 = vcmp.le.f32.partialorder %v129_v20, %v801_v28 }
  0x17   :  { %vm163_vm12 = vcmp.le.f32.partialorder %v139_v55, %v835_v33  ;;  %v209_v61 = vmul.f32 %v840_v35, %v184_v58  ;;  %v230_v4 = vadd.f32 %v206_v57, %v720_v15  ;;  %248 = vst.msk [vmem:[#allocation2 + $0x30] sm:$0xff] %vm89_vm0, %v224_v56  ;;  %v137_v45 = vld [vmem:[#allocation2 + $0x97] sm:$0x3]  ;;  %244 = vst.msk [vmem:[#allocation2 + $0x8] sm:$0xff] %vm89_vm0, %v220_v38  ;;  %v174_v47 = vsel %vm150_vm15, %v126_v0, 0.0  ;;  %v135_v56 = vld [vmem:[#allocation2 + $0x87] sm:$0xff] }
  0x18   :  { %v142_v59 = vld [vmem:[#allocation2 + $0xcf] sm:$0xff]  ;;  %v187_v62 = vsel %vm163_vm12, %v139_v55, 0.0  ;;  %251 = vst.msk [vmem:[#allocation2 + $0x50] sm:$0xff] %vm89_vm0, %v227_v60  ;;  %v140_v48 = vld [vmem:[#allocation2 + $0xb7] sm:$0x3]  ;;  %v222_v50 = vadd.f32 %v198_v43, %v658_v5  ;;  %v199_v51 = vmul.f32 %v840_v35, %v174_v47  ;;  %v176_v52 = vsel %vm152_vm2, %v128_v1, 0.0 }
  0x19   :  { %vm166_vm13 = vcmp.le.f32.partialorder %v142_v59, %v835_v33  ;;  %v212_v11 = vmul.f32 %v840_v35, %v187_v62  ;;  %v233_v29 = vadd.f32 %v209_v61, %v746_v19  ;;  %254 = vst.msk [vmem:[#allocation2 + $0x70] sm:$0xff] %vm89_vm0, %v230_v4  ;;  %v143_v53 = vld [vmem:[#allocation2 + $0xd7] sm:$0x3]  ;;  %v201_v54 = vmul.f32 %v840_v35, %v176_v52  ;;  %v138_v1 = vld [vmem:[#allocation2 + $0xa7] sm:$0xff] }
  0x1a   :  { %v145_v63 = vld [vmem:[#allocation2 + $0xef] sm:$0xff]  ;;  %v190_v16 = vsel %vm166_vm13, %v142_v59, 0.0  ;;  %v177_v55 = vsel %vm153_vm3, %v129_v20, 0.0  ;;  %vm155_vm4 = vcmp.le.f32.partialorder %v131_v21, %v863_v40  ;;  %vm156_vm5 = vcmp.le.f32.partialorder %v132_v44, %v801_v28  ;;  %246 = vst.msk [vmem:[#allocation2 + $0x18] sm:$0x3] %vm100_vm1, %v222_v50 }
  0x1b   :  { %vm169_vm14 = vcmp.le.f32.partialorder %v145_v63, %v835_v33  ;;  %v215_v34 = vmul.f32 %v840_v35, %v190_v16  ;;  %v236_v41 = vadd.f32 %v212_v11, %v772_v24  ;;  %257 = vst.msk [vmem:[#allocation2 + $0x90] sm:$0xff] %vm89_vm0, %v233_v29  ;;  %v146_v57 = vld [vmem:[#allocation2 + $0xf7] sm:$0x3]  ;;  %v223_v58 = vadd.f32 %v199_v51, %v663_v6 }
  0x1c   :  { %v193_v37 = vsel %vm169_vm14, %v145_v63, 0.0  ;;  %v202_v59 = vmul.f32 %v840_v35, %v177_v55  ;;  %v179_v60 = vsel %vm155_vm4, %v131_v21, 0.0  ;;  %v180_v61 = vsel %vm156_vm5, %v132_v44, 0.0 }
  0x1d   :  { %v218_v42 = vmul.f32 %v840_v35, %v193_v37  ;;  %v239_v46 = vadd.f32 %v215_v34, %v798_v27  ;;  %260 = vst.msk [vmem:[#allocation2 + $0xb0] sm:$0xff] %vm89_vm0, %v236_v41  ;;  %v225_v62 = vadd.f32 %v201_v54, %v679_v8  ;;  %v204_v63 = vmul.f32 %v840_v35, %v179_v60  ;;  %v141_v34 = vld [vmem:[#allocation2 + $0xc7] sm:$0xff] }
  0x1e   :  { %v205_v0 = vmul.f32 %v840_v35, %v180_v61  ;;  %vm158_vm6 = vcmp.le.f32.partialorder %v134_v39, %v863_v40  ;;  %247 = vst.msk [vmem:[#allocation2 + $0x28] sm:$0xff] %vm89_vm0, %v223_v58  ;;  %v226_v4 = vadd.f32 %v202_v59, %v684_v9  ;;  %vm159_vm7 = vcmp.le.f32.partialorder %v135_v56, %v801_v28  ;;  %v269_v52 = vld [vmem:[#allocation2 + $0xf] sm:$0xff] }
  0x1f   :  { %v242_v49 = vadd.f32 %v218_v42, %v827_v32  ;;  %263 = vst.msk [vmem:[#allocation2 + $0xd0] sm:$0xff] %vm89_vm0, %v239_v46  ;;  %v182_v11 = vsel %vm158_vm6, %v134_v39, 0.0  ;;  %vm161_vm8 = vcmp.le.f32.partialorder %v137_v45, %v863_v40  ;;  %v228_v16 = vadd.f32 %v204_v63, %v710_v13  ;;  %v144_v39 = vld [vmem:[#allocation2 + $0xe7] sm:$0xff] }
  0x20   :  { %249 = vst.msk [vmem:[#allocation2 + $0x38] sm:$0x3] %vm100_vm1, %v225_v62  ;;  %v229_v20 = vadd.f32 %v205_v0, %v715_v14  ;;  %v207_v21 = vmul.f32 %v840_v35, %v182_v11  ;;  %v183_v29 = vsel %vm159_vm7, %v135_v56, 0.0  ;;  %v185_v38 = vsel %vm161_vm8, %v137_v45, 0.0 }
  0x21   :  { %266 = vst.msk [vmem:[#allocation2 + $0xf0] sm:$0xff] %vm89_vm0, %v242_v49  ;;  %250 = vst.msk [vmem:[#allocation2 + $0x48] sm:$0xff] %vm89_vm0, %v226_v4  ;;  %v208_v37 = vmul.f32 %v840_v35, %v183_v29  ;;  %vm162_vm9 = vcmp.le.f32.partialorder %v138_v1, %v801_v28  ;;  %vm164_vm10 = vcmp.le.f32.partialorder %v140_v48, %v863_v40  ;;  %v268_v49 = vld [vmem:[#allocation2 + $0x7] sm:$0xff]  ;;  %v270_v60 = vld [vmem:[#allocation2 + $0x17] sm:$0x3] }
  0x22   :  { %252 = vst.msk [vmem:[#allocation2 + $0x58] sm:$0x3] %vm100_vm1, %v228_v16  ;;  %v231_v41 = vadd.f32 %v207_v21, %v736_v17  ;;  %v210_v42 = vmul.f32 %v840_v35, %v185_v38  ;;  %v186_v43 = vsel %vm162_vm9, %v138_v1, 0.0  ;;  %v188_v44 = vsel %vm164_vm10, %v140_v48, 0.0 }
  0x23   :  { %253 = vst.msk [vmem:[#allocation2 + $0x68] sm:$0xff] %vm89_vm0, %v229_v20  ;;  %v232_v46 = vadd.f32 %v208_v37, %v741_v18  ;;  %v211_v47 = vmul.f32 %v840_v35, %v186_v43  ;;  %v213_v45 = vmul.f32 %v840_v35, %v188_v44  ;;  %vm165_vm11 = vcmp.le.f32.partialorder %v141_v34, %v801_v28 }
  0x24   :  { %255 = vst.msk [vmem:[#allocation2 + $0x78] sm:$0x3] %vm100_vm1, %v231_v41  ;;  %v234_v50 = vadd.f32 %v210_v42, %v762_v22  ;;  %v189_v51 = vsel %vm165_vm11, %v141_v34, 0.0  ;;  %vm167_vm12 = vcmp.le.f32.partialorder %v143_v53, %v863_v40  ;;  %vm168_vm13 = vcmp.le.f32.partialorder %v144_v39, %v801_v28 }
  0x25   :  { %256 = vst.msk [vmem:[#allocation2 + $0x88] sm:$0xff] %vm89_vm0, %v232_v46  ;;  %v235_v48 = vadd.f32 %v211_v47, %v767_v23  ;;  %v237_v54 = vadd.f32 %v213_v45, %v788_v25  ;;  %v214_v55 = vmul.f32 %v840_v35, %v189_v51  ;;  %v191_v56 = vsel %vm167_vm12, %v143_v53, 0.0  ;;  %v271_v53 = vld [vmem:[#allocation2 + $0x27] sm:$0xff]  ;;  %v272_v0 = vld [vmem:[#allocation2 + $0x2f] sm:$0xff] }
  0x26   :  { %258 = vst.msk [vmem:[#allocation2 + $0x98] sm:$0x3] %vm100_vm1, %v234_v50  ;;  %v216_v58 = vmul.f32 %v840_v35, %v191_v56  ;;  %v192_v59 = vsel %vm168_vm13, %v144_v39, 0.0  ;;  %vm170_vm14 = vcmp.le.f32.partialorder %v146_v57, %v863_v40  ;;  %vm292_vm15 = vcmp.le.f32.partialorder %v268_v49, %v801_v28 }
  0x27   :  { %259 = vst.msk [vmem:[#allocation2 + $0xa8] sm:$0xff] %vm89_vm0, %v235_v48  ;;  %v238_v61 = vadd.f32 %v214_v55, %v793_v26  ;;  %v217_v62 = vmul.f32 %v840_v35, %v192_v59  ;;  %v194_v63 = vsel %vm170_vm14, %v146_v57, 0.0  ;;  %vm293_vm2 = vcmp.le.f32.partialorder %v269_v52, %v835_v33  ;;  %v273_v57 = vld [vmem:[#allocation2 + $0x37] sm:$0x3] }
  0x28   :  { %261 = vst.msk [vmem:[#allocation2 + $0xb8] sm:$0x3] %vm100_vm1, %v237_v54  ;;  %v240_v1 = vadd.f32 %v216_v58, %v817_v30  ;;  %v219_v4 = vmul.f32 %v840_v35, %v194_v63  ;;  %v316_v11 = vsel %vm292_vm15, %v268_v49, 0.0  ;;  %v317_v16 = vsel %vm293_vm2, %v269_v52, 0.0  ;;  %v274_v34 = vld [vmem:[#allocation2 + $0x47] sm:$0xff]  ;;  %v275_v39 = vld [vmem:[#allocation2 + $0x4f] sm:$0xff] }
  0x29   :  { %262 = vst.msk [vmem:[#allocation2 + $0xc8] sm:$0xff] %vm89_vm0, %v238_v61  ;;  %v241_v20 = vadd.f32 %v217_v62, %v822_v31  ;;  %v340_v21 = vmul.f32 %v316_v11, %v840_v35  ;;  %v341_v29 = vmul.f32 %v317_v16, %v840_v35  ;;  %vm294_vm3 = vcmp.le.f32.partialorder %v270_v60, %v863_v40  ;;  %v276_v45 = vld [vmem:[#allocation2 + $0x57] sm:$0x3] }
  0x2a   :  { %264 = vst.msk [vmem:[#allocation2 + $0xd8] sm:$0x3] %vm100_vm1, %v240_v1  ;;  %v243_v37 = vadd.f32 %v219_v4, %v851_v36  ;;  %v318_v38 = vsel %vm294_vm3, %v270_v60, 0.0  ;;  %vm295_vm4 = vcmp.le.f32.partialorder %v271_v53, %v801_v28  ;;  %vm296_vm5 = vcmp.le.f32.partialorder %v272_v0, %v835_v33  ;;  %v277_v52 = vld [vmem:[#allocation2 + $0x67] sm:$0xff]  ;;  %v278_v48 = vld [vmem:[#allocation2 + $0x6f] sm:$0xff] }
  0x2b   :  { %265 = vst.msk [vmem:[#allocation2 + $0xe8] sm:$0xff] %vm89_vm0, %v241_v20  ;;  %v364_v41 = vadd.f32 %v340_v21, %v644_v2  ;;  %v365_v42 = vadd.f32 %v341_v29, %v649_v3  ;;  %v342_v43 = vmul.f32 %v318_v38, %v840_v35  ;;  %v319_v44 = vsel %vm295_vm4, %v271_v53, 0.0  ;;  %v279_v61 = vld [vmem:[#allocation2 + $0x77] sm:$0x3] }
  0x2c   :  { %267 = vst.msk [vmem:[#allocation2 + $0xf8] sm:$0x3] %vm100_vm1, %v243_v37  ;;  %v320_v46 = vsel %vm296_vm5, %v272_v0, 0.0  ;;  %v343_v47 = vmul.f32 %v319_v44, %v840_v35  ;;  %vm297_vm6 = vcmp.le.f32.partialorder %v273_v57, %v863_v40  ;;  %vm298_vm7 = vcmp.le.f32.partialorder %v274_v34, %v801_v28  ;;  %v280_v62 = vld [vmem:[#allocation2 + $0x87] sm:$0xff]  ;;  %v281_v0 = vld [vmem:[#allocation2 + $0x8f] sm:$0xff] }
  0x2d   :  { %388 = vst.msk [vmem:[#allocation2 + $0x8] sm:$0xff] %vm89_vm0, %v364_v41  ;;  %389 = vst.msk [vmem:[#allocation2 + $0x10] sm:$0xff] %vm89_vm0, %v365_v42  ;;  %v366_v49 = vadd.f32 %v342_v43, %v658_v5  ;;  %v344_v50 = vmul.f32 %v320_v46, %v840_v35  ;;  %v321_v51 = vsel %vm297_vm6, %v273_v57, 0.0  ;;  %vm299_vm8 = vcmp.le.f32.partialorder %v275_v39, %v835_v33  ;;  %v282_v21 = vld [vmem:[#allocation2 + $0x97] sm:$0x3] }
  0x2e   :  { %v367_v54 = vadd.f32 %v343_v47, %v663_v6  ;;  %v345_v55 = vmul.f32 %v321_v51, %v840_v35  ;;  %v322_v56 = vsel %vm298_vm7, %v274_v34, 0.0  ;;  %v323_v58 = vsel %vm299_vm8, %v275_v39, 0.0  ;;  %v283_v37 = vld [vmem:[#allocation2 + $0xa7] sm:$0xff]  ;;  %v284_v38 = vld [vmem:[#allocation2 + $0xaf] sm:$0xff] }
  0x2f   :  { %390 = vst.msk [vmem:[#allocation2 + $0x18] sm:$0x3] %vm100_vm1, %v366_v49  ;;  %v368_v59 = vadd.f32 %v344_v50, %v668_v7  ;;  %v346_v60 = vmul.f32 %v322_v56, %v840_v35  ;;  %v347_v5 = vmul.f32 %v323_v58, %v840_v35  ;;  %vm300_vm9 = vcmp.le.f32.partialorder %v276_v45, %v863_v40  ;;  %v285_v47 = vld [vmem:[#allocation2 + $0xb7] sm:$0x3] }
  0x30   :  { %391 = vst.msk [vmem:[#allocation2 + $0x28] sm:$0xff] %vm89_vm0, %v367_v54  ;;  %v369_v63 = vadd.f32 %v345_v55, %v679_v8  ;;  %v324_v53 = vsel %vm300_vm9, %v276_v45, 0.0  ;;  %vm301_vm10 = vcmp.le.f32.partialorder %v277_v52, %v801_v28  ;;  %vm302_vm11 = vcmp.le.f32.partialorder %v278_v48, %v835_v33  ;;  %v286_v45 = vld [vmem:[#allocation2 + $0xc7] sm:$0xff]  ;;  %v287_v51 = vld [vmem:[#allocation2 + $0xcf] sm:$0xff] }
  0x31   :  { %392 = vst.msk [vmem:[#allocation2 + $0x30] sm:$0xff] %vm89_vm0, %v368_v59  ;;  %v370_v1 = vadd.f32 %v346_v60, %v684_v9  ;;  %v371_v4 = vadd.f32 %v347_v5, %v689_v10  ;;  %v348_v11 = vmul.f32 %v324_v53, %v840_v35  ;;  %v325_v16 = vsel %vm301_vm10, %v277_v52, 0.0  ;;  %v288_v58 = vld [vmem:[#allocation2 + $0xd7] sm:$0x3] }
  0x32   :  { %393 = vst.msk [vmem:[#allocation2 + $0x38] sm:$0x3] %vm100_vm1, %v369_v63  ;;  %v326_v20 = vsel %vm302_vm11, %v278_v48, 0.0  ;;  %v349_v8 = vmul.f32 %v325_v16, %v840_v35  ;;  %vm303_vm12 = vcmp.le.f32.partialorder %v279_v61, %v863_v40  ;;  %vm304_vm13 = vcmp.le.f32.partialorder %v280_v62, %v801_v28 }
  0x33   :  { %394 = vst.msk [vmem:[#allocation2 + $0x48] sm:$0xff] %vm89_vm0, %v370_v1  ;;  %395 = vst.msk [vmem:[#allocation2 + $0x50] sm:$0xff] %vm89_vm0, %v371_v4  ;;  %v372_v29 = vadd.f32 %v348_v11, %v710_v13  ;;  %v350_v57 = vmul.f32 %v326_v20, %v840_v35  ;;  %v327_v34 = vsel %vm303_vm12, %v279_v61, 0.0  ;;  %vm305_vm14 = vcmp.le.f32.partialorder %v281_v0, %v835_v33  ;;  %v289_v61 = vld [vmem:[#allocation2 + $0xe7] sm:$0xff]  ;;  %v291_v16 = vld [vmem:[#allocation2 + $0xf7] sm:$0x3] }
  0x34   :  { %v373_v39 = vadd.f32 %v349_v8, %v715_v14  ;;  %v351_v41 = vmul.f32 %v327_v34, %v840_v35  ;;  %v328_v42 = vsel %vm304_vm13, %v280_v62, 0.0  ;;  %v329_v43 = vsel %vm305_vm14, %v281_v0, 0.0  ;;  %v290_v62 = vld [vmem:[#allocation2 + $0xef] sm:$0xff]  ;;  %v412_v20 = vld [vmem:[#allocation2 + $0x7] sm:$0xff] }
  0x35   :  { %396 = vst.msk [vmem:[#allocation2 + $0x58] sm:$0x3] %vm100_vm1, %v372_v29  ;;  %v374_v44 = vadd.f32 %v350_v57, %v720_v15  ;;  %v352_v46 = vmul.f32 %v328_v42, %v840_v35  ;;  %v353_v13 = vmul.f32 %v329_v43, %v840_v35  ;;  %vm306_vm15 = vcmp.le.f32.partialorder %v282_v21, %v863_v40 }
  0x36   :  { %397 = vst.msk [vmem:[#allocation2 + $0x68] sm:$0xff] %vm89_vm0, %v373_v39  ;;  %v375_v49 = vadd.f32 %v351_v41, %v736_v17  ;;  %v330_v50 = vsel %vm306_vm15, %v282_v21, 0.0  ;;  %vm307_vm2 = vcmp.le.f32.partialorder %v283_v37, %v801_v28  ;;  %vm308_vm3 = vcmp.le.f32.partialorder %v284_v38, %v835_v33 }
  0x37   :  { %398 = vst.msk [vmem:[#allocation2 + $0x70] sm:$0xff] %vm89_vm0, %v374_v44  ;;  %v376_v52 = vadd.f32 %v352_v46, %v741_v18  ;;  %v377_v48 = vadd.f32 %v353_v13, %v746_v19  ;;  %v354_v54 = vmul.f32 %v330_v50, %v840_v35  ;;  %v331_v55 = vsel %vm307_vm2, %v283_v37, 0.0  ;;  %v415_v41 = vld [vmem:[#allocation2 + $0x27] sm:$0xff] }
  0x38   :  { %399 = vst.msk [vmem:[#allocation2 + $0x78] sm:$0x3] %vm100_vm1, %v375_v49  ;;  %v332_v56 = vsel %vm308_vm3, %v284_v38, 0.0  ;;  %v355_v17 = vmul.f32 %v331_v55, %v840_v35  ;;  %vm309_vm4 = vcmp.le.f32.partialorder %v285_v47, %v863_v40  ;;  %vm310_vm5 = vcmp.le.f32.partialorder %v286_v45, %v801_v28  ;;  %v413_v38 = vld [vmem:[#allocation2 + $0xf] sm:$0xff] }
  0x39   :  { %400 = vst.msk [vmem:[#allocation2 + $0x88] sm:$0xff] %vm89_vm0, %v376_v52  ;;  %401 = vst.msk [vmem:[#allocation2 + $0x90] sm:$0xff] %vm89_vm0, %v377_v48  ;;  %v378_v59 = vadd.f32 %v354_v54, %v762_v22  ;;  %v356_v60 = vmul.f32 %v332_v56, %v840_v35  ;;  %v333_v5 = vsel %vm309_vm4, %v285_v47, 0.0  ;;  %vm311_vm6 = vcmp.le.f32.partialorder %v287_v51, %v835_v33  ;;  %v416_v42 = vld [vmem:[#allocation2 + $0x2f] sm:$0xff] }
  0x3a   :  { %v379_v63 = vadd.f32 %v355_v17, %v767_v23  ;;  %v357_v53 = vmul.f32 %v333_v5, %v840_v35  ;;  %v334_v0 = vsel %vm310_vm5, %v286_v45, 0.0  ;;  %v335_v1 = vsel %vm311_vm6, %v287_v51, 0.0  ;;  %v418_v49 = vld [vmem:[#allocation2 + $0x47] sm:$0xff]  ;;  %v419_v50 = vld [vmem:[#allocation2 + $0x4f] sm:$0xff] }
  0x3b   :  { %402 = vst.msk [vmem:[#allocation2 + $0x98] sm:$0x3] %vm100_vm1, %v378_v59  ;;  %v380_v4 = vadd.f32 %v356_v60, %v772_v24  ;;  %v358_v11 = vmul.f32 %v334_v0, %v840_v35  ;;  %v359_v22 = vmul.f32 %v335_v1, %v840_v35  ;;  %vm312_vm7 = vcmp.le.f32.partialorder %v288_v58, %v863_v40 }
  0x3c   :  { %403 = vst.msk [vmem:[#allocation2 + $0xa8] sm:$0xff] %vm89_vm0, %v379_v63  ;;  %v381_v8 = vadd.f32 %v357_v53, %v788_v25  ;;  %v336_v21 = vsel %vm312_vm7, %v288_v58, 0.0  ;;  %vm313_vm8 = vcmp.le.f32.partialorder %v289_v61, %v801_v28  ;;  %vm314_vm9 = vcmp.le.f32.partialorder %v290_v62, %v835_v33 }
  0x3d   :  { %404 = vst.msk [vmem:[#allocation2 + $0xb0] sm:$0xff] %vm89_vm0, %v380_v4  ;;  %v382_v29 = vadd.f32 %v358_v11, %v793_v26  ;;  %v383_v57 = vadd.f32 %v359_v22, %v798_v27  ;;  %v360_v34 = vmul.f32 %v336_v21, %v840_v35  ;;  %v337_v37 = vsel %vm313_vm8, %v289_v61, 0.0  ;;  %v421_v56 = vld [vmem:[#allocation2 + $0x67] sm:$0xff] }
  0x3e   :  { %405 = vst.msk [vmem:[#allocation2 + $0xb8] sm:$0x3] %vm100_vm1, %v381_v8  ;;  %v338_v39 = vsel %vm314_vm9, %v290_v62, 0.0  ;;  %v361_v25 = vmul.f32 %v337_v37, %v840_v35  ;;  %vm315_vm10 = vcmp.le.f32.partialorder %v291_v16, %v863_v40  ;;  %vm436_vm11 = vcmp.le.f32.partialorder %v412_v20, %v801_v28  ;;  %v422_v5 = vld [vmem:[#allocation2 + $0x6f] sm:$0xff] }
  0x3f   :  { %406 = vst.msk [vmem:[#allocation2 + $0xc8] sm:$0xff] %vm89_vm0, %v382_v29  ;;  %407 = vst.msk [vmem:[#allocation2 + $0xd0] sm:$0xff] %vm89_vm0, %v383_v57  ;;  %v384_v43 = vadd.f32 %v360_v34, %v817_v30  ;;  %v362_v44 = vmul.f32 %v338_v39, %v840_v35  ;;  %v339_v46 = vsel %vm315_vm10, %v291_v16, 0.0  ;;  %v460_v13 = vsel %vm436_vm11, %v412_v20, 0.0 }
  0x40   :  { %v385_v47 = vadd.f32 %v361_v25, %v822_v31  ;;  %v363_v45 = vmul.f32 %v339_v46, %v840_v35  ;;  %v484_v40 = vmul.f32 %v460_v13, %v840_v35  ;;  %vm437_vm12 = vcmp.le.f32.partialorder %v413_v38, %v835_v33  ;;  %v424_v53 = vld [vmem:[#allocation2 + $0x87] sm:$0xff]  ;;  %v425_v16 = vld [vmem:[#allocation2 + $0x8f] sm:$0xff] }
  0x41   :  { %408 = vst.msk [vmem:[#allocation2 + $0xd8] sm:$0x3] %vm100_vm1, %v384_v43  ;;  %v386_v51 = vadd.f32 %v362_v44, %v827_v32  ;;  %v461_v52 = vsel %vm437_vm12, %v413_v38, 0.0  ;;  %vm439_vm13 = vcmp.le.f32.partialorder %v415_v41, %v801_v28  ;;  %vm440_vm14 = vcmp.le.f32.partialorder %v416_v42, %v835_v33 }
  0x42   :  { %409 = vst.msk [vmem:[#allocation2 + $0xe8] sm:$0xff] %vm89_vm0, %v385_v47  ;;  %v387_v30 = vadd.f32 %v363_v45, %v851_v36  ;;  %v508_v48 = vadd.f32 %v484_v40, %v644_v2  ;;  %v485_v54 = vmul.f32 %v461_v52, %v840_v35  ;;  %v463_v55 = vsel %vm439_vm13, %v415_v41, 0.0 }
  0x43   :  { %410 = vst.msk [vmem:[#allocation2 + $0xf0] sm:$0xff] %vm89_vm0, %v386_v51  ;;  %v487_v17 = vmul.f32 %v463_v55, %v840_v35  ;;  %v464_v58 = vsel %vm440_vm14, %v416_v42, 0.0  ;;  %vm442_vm15 = vcmp.le.f32.partialorder %v418_v49, %v801_v28  ;;  %vm443_vm2 = vcmp.le.f32.partialorder %v419_v50, %v835_v33  ;;  %v427_v20 = vld [vmem:[#allocation2 + $0xa7] sm:$0xff] }
  0x44   :  { %411 = vst.msk [vmem:[#allocation2 + $0xf8] sm:$0x3] %vm100_vm1, %v387_v30  ;;  %v532_v59 = vmax.f32 %v508_v48, %v699_v12  ;;  %v509_v36 = vadd.f32 %v485_v54, %v649_v3  ;;  %v488_v2 = vmul.f32 %v464_v58, %v840_v35  ;;  %v466_v60 = vsel %vm442_vm15, %v418_v49, 0.0  ;;  %v428_v37 = vld [vmem:[#allocation2 + $0xaf] sm:$0xff] }
  0x45   :  { %v511_v61 = vadd.f32 %v487_v17, %v663_v6  ;;  %v490_v62 = vmul.f32 %v466_v60, %v840_v35  ;;  %v467_v63 = vsel %vm443_vm2, %v419_v50, 0.0  ;;  %vm445_vm3 = vcmp.le.f32.partialorder %v421_v56, %v801_v28 }
  0x46   :  { %583 = vst.msk [vmem:[%s1189_s3] sm:$0xff] %vm89_vm0, %v532_v59  ;;  %v533_v0 = vmax.f32 %v509_v36, %v699_v12  ;;  %v512_v3 = vadd.f32 %v488_v2, %v668_v7  ;;  %v491_v1 = vmul.f32 %v467_v63, %v840_v35  ;;  %v469_v4 = vsel %vm445_vm3, %v421_v56, 0.0  ;;  %v430_v39 = vld [vmem:[#allocation2 + $0xc7] sm:$0xff]  ;;  %v431_v25 = vld [vmem:[#allocation2 + $0xcf] sm:$0xff] }
  0x47   :  { %v535_v6 = vmax.f32 %v511_v61, %v699_v12  ;;  %v514_v11 = vadd.f32 %v490_v62, %v684_v9  ;;  %v493_v22 = vmul.f32 %v469_v4, %v840_v35  ;;  %vm446_vm1 = vcmp.le.f32.partialorder %v422_v5, %v835_v33 }
  0x48   :  { %584 = vst.msk [vmem:[%s1189_s3 + $0x8] sm:$0xff] %vm89_vm0, %v533_v0  ;;  %v536_v7 = vmax.f32 %v512_v3, %v699_v12  ;;  %v515_v8 = vadd.f32 %v491_v1, %v689_v10  ;;  %v470_v21 = vsel %vm446_vm1, %v422_v5, 0.0  ;;  %vm448_vm4 = vcmp.le.f32.partialorder %v424_v53, %v801_v28 }
  0x49   :  { %586 = vst.msk [vmem:[%s1189_s3 + $0x18] sm:$0xff] %vm89_vm0, %v535_v6  ;;  %v538_v9 = vmax.f32 %v514_v11, %v699_v12  ;;  %v517_v29 = vadd.f32 %v493_v22, %v715_v14  ;;  %v494_v57 = vmul.f32 %v470_v21, %v840_v35  ;;  %v472_v34 = vsel %vm448_vm4, %v424_v53, 0.0  ;;  %v433_v47 = vld [vmem:[#allocation2 + $0xe7] sm:$0xff] }
  0x4a   :  { %587 = vst.msk [vmem:[%s1189_s3 + $0x20] sm:$0xff] %vm89_vm0, %v536_v7  ;;  %v539_v10 = vmax.f32 %v515_v8, %v699_v12  ;;  %v496_v38 = vmul.f32 %v472_v34, %v840_v35  ;;  %vm449_vm5 = vcmp.le.f32.partialorder %v425_v16, %v835_v33  ;;  %vm451_vm6 = vcmp.le.f32.partialorder %v427_v20, %v801_v28  ;;  %v434_v45 = vld [vmem:[#allocation2 + $0xef] sm:$0xff] }
  0x4b   :  { %589 = vst.msk [vmem:[%s1189_s3 + $0x30] sm:$0xff] %vm89_vm0, %v538_v9  ;;  %v541_v14 = vmax.f32 %v517_v29, %v699_v12  ;;  %v518_v41 = vadd.f32 %v494_v57, %v720_v15  ;;  %v473_v42 = vsel %vm449_vm5, %v425_v16, 0.0  ;;  %v475_v43 = vsel %vm451_vm6, %v427_v20, 0.0 }
  0x4c   :  { %590 = vst.msk [vmem:[%s1189_s3 + $0x38] sm:$0xff] %vm89_vm0, %v539_v10  ;;  %v520_v44 = vadd.f32 %v496_v38, %v741_v18  ;;  %v497_v46 = vmul.f32 %v473_v42, %v840_v35  ;;  %v499_v13 = vmul.f32 %v475_v43, %v840_v35  ;;  %vm452_vm7 = vcmp.le.f32.partialorder %v428_v37, %v835_v33 }
  0x4d   :  { %592 = vst.msk [vmem:[%s1189_s3 + $0x48] sm:$0xff] %vm89_vm0, %v541_v14  ;;  %v542_v15 = vmax.f32 %v518_v41, %v699_v12  ;;  %v476_v40 = vsel %vm452_vm7, %v428_v37, 0.0  ;;  %vm454_vm8 = vcmp.le.f32.partialorder %v430_v39, %v801_v28  ;;  %vm455_vm9 = vcmp.le.f32.partialorder %v431_v25, %v835_v33 }
  0x4e   :  { %v544_v18 = vmax.f32 %v520_v44, %v699_v12  ;;  %v521_v49 = vadd.f32 %v497_v46, %v746_v19  ;;  %v523_v50 = vadd.f32 %v499_v13, %v767_v23  ;;  %v500_v51 = vmul.f32 %v476_v40, %v840_v35 }
  0x4f   :  { %593 = vst.msk [vmem:[%s1189_s3 + $0x50] sm:$0xff] %vm89_vm0, %v542_v15  ;;  %v478_v52 = vsel %vm454_vm8, %v430_v39, 0.0  ;;  %v479_v30 = vsel %vm455_vm9, %v431_v25, 0.0  ;;  %vm457_vm10 = vcmp.le.f32.partialorder %v433_v47, %v801_v28  ;;  %vm458_vm11 = vcmp.le.f32.partialorder %v434_v45, %v835_v33 }
  0x50   :  { %595 = vst.msk [vmem:[%s1189_s3 + $0x60] sm:$0xff] %vm89_vm0, %v544_v18  ;;  %v545_v19 = vmax.f32 %v521_v49, %v699_v12  ;;  %v547_v23 = vmax.f32 %v523_v50, %v699_v12  ;;  %v524_v48 = vadd.f32 %v500_v51, %v772_v24  ;;  %v502_v54 = vmul.f32 %v478_v52, %v840_v35 }
  0x51   :  { %v503_v55 = vmul.f32 %v479_v30, %v840_v35  ;;  %v481_v56 = vsel %vm457_vm10, %v433_v47, 0.0  ;;  %v482_v17 = vsel %vm458_vm11, %v434_v45, 0.0 }
  0x52   :  { %596 = vst.msk [vmem:[%s1189_s3 + $0x68] sm:$0xff] %vm89_vm0, %v545_v19  ;;  %598 = vst.msk [vmem:[%s1189_s3 + $0x78] sm:$0xff] %vm89_vm0, %v547_v23  ;;  %v548_v28 = vmax.f32 %v524_v48, %v699_v12  ;;  %v526_v24 = vadd.f32 %v502_v54, %v793_v26  ;;  %v505_v33 = vmul.f32 %v481_v56, %v840_v35 }
  0x53   :  { %v506_v58 = vmul.f32 %v482_v17, %v840_v35  ;;  %v527_v59 = vadd.f32 %v503_v55, %v798_v27 }
  0x54   :  { %599 = vst.msk [vmem:[%s1189_s3 + $0x80] sm:$0xff] %vm89_vm0, %v548_v28  ;;  %v550_v36 = vmax.f32 %v526_v24, %v699_v12  ;;  %v529_v2 = vadd.f32 %v505_v33, %v822_v31 }
  0x55   :  { %v530_v60 = vadd.f32 %v506_v58, %v827_v32  ;;  %v551_v5 = vmax.f32 %v527_v59, %v699_v12 }
  0x56   :  { %601 = vst.msk [vmem:[%s1189_s3 + $0x90] sm:$0xff] %vm89_vm0, %v550_v36  ;;  %v553_v26 = vmax.f32 %v529_v2, %v699_v12 }
  0x57   :  { %v554_v27 = vmax.f32 %v530_v60, %v699_v12  ;;  %602 = vst.msk [vmem:[%s1189_s3 + $0x98] sm:$0xff] %vm89_vm0, %v551_v5 }
  0x58   :  { %604 = vst.msk [vmem:[%s1189_s3 + $0xa8] sm:$0xff] %vm89_vm0, %v553_v26 }
  0x59   :  { %605 = vst.msk [vmem:[%s1189_s3 + $0xb0] sm:$0xff] %vm89_vm0, %v554_v27 }

</bundles_post_ra>
